<compile_context>
chip_gen: v7x
topology: tpu7x:2x2x1
jax: 0.10.0
libtpu: 0.0.40
codegen_flags: <defaults>
</compile_context>

<pallas_src>
import jax
import jax.numpy as jnp
from jax.experimental import pallas as pl
from jax.experimental.pallas import tpu as pltpu

SMOOTH = 1.0
IGNORE_LB = 255

# Conservative per-tile working-set budget (double-buffered inputs + f32 temps)
# and an explicit scoped-VMEM limit that is safe on v5e / v6e / v7x.
_VMEM_TILE_BUDGET = 12 * 1024 * 1024
_VMEM_LIMIT_BYTES = 32 * 1024 * 1024


def _dice_kernel(logits_ref, label_ref, out_ref, acc_n_ref, acc_d_ref):
    i = pl.program_id(1)  # reduction (row-tile) axis within this shard

    @pl.when(i == 0)
    def _init():
        acc_n_ref[...] = jnp.zeros_like(acc_n_ref)
        acc_d_ref[...] = jnp.zeros_like(acc_d_ref)

    # Hot path: sigmoid (EUP) + compare/select/add (VPU); no XLU, no SMEM.
    probs = jax.nn.sigmoid(logits_ref[...].astype(jnp.float32))
    lbl = label_ref[...].astype(jnp.float32)   # {0, 1, 255} exact in f32
    mask = lbl == 1.0                          # label==1 already excludes 255
    sel = jnp.where(mask, probs, 0.0)          # == probs * one_hot
    one = jnp.where(mask, 1.0, 0.0)            # == one_hot

    rows, w = probs.shape
    acc_n_ref[...] += sel.reshape(rows // 8, 8, w).sum(axis=0)
    acc_d_ref[...] += (probs + one).reshape(rows // 8, 8, w).sum(axis=0)

    @pl.when(i == pl.num_programs(1) - 1)
    def _finalize():
        numer = jnp.sum(acc_n_ref[...])
        denom = jnp.sum(acc_d_ref[...])
        # Pack the two partials into this shard's (1, 8, 128) output block:
        # sublane row 0 := numer, row 1 := denom (rest zero).
        row = jax.lax.broadcasted_iota(jnp.int32, out_ref.shape, 1)
        out_ref[...] = jnp.where(row == 0, numer,
                                 jnp.where(row == 1, denom, 0.0))


def _pick_row_tile(rows, w, logit_bytes, label_bytes, step):
    """Largest multiple of `step` dividing `rows` whose tile fits the budget."""
    per_row = w * (2 * (logit_bytes + label_bytes) + 2 * 4)
    max_rows = max(step, _VMEM_TILE_BUDGET // per_row)
    best = step
    t = step
    limit = min(rows, max_rows)
    while t <= limit:
        if rows % t == 0:
            best = t
        t += step
    return best


def dice_loss(logits, label, *, smooth=SMOOTH):
    """logits: (1, H, W) float, label: (1, H, W) int. Returns scalar f32 loss."""
    assert logits.ndim == 3 and logits.shape[0] == 1
    assert logits.shape == label.shape
    _, H, W = logits.shape
    # TODO(synk): ragged H (not a multiple of 8) would need a masked tail tile.
    assert H % 8 == 0, "H must be a multiple of 8"

    logits2d = logits.reshape(H, W)
    label2d = label.reshape(H, W)

    if H % 32 == 0:
        # Narrow labels to 1 byte; 8-bit blocks keep the sublane dim a
        # multiple of 32 so the packed tiling stays legal.
        label2d = label2d.astype(jnp.uint8)
        step = 32
    else:
        label2d = label2d.astype(jnp.int32)
        step = 8

    num_shards = 2 if H % (2 * step) == 0 else 1   # megacore row split (v7x)
    rows_per_shard = H // num_shards
    row_tile = _pick_row_tile(rows_per_shard, W, logits2d.dtype.itemsize,
                              label2d.dtype.itemsize, step)
    tiles_per_shard = rows_per_shard // row_tile

    in_map = lambda c, i: (c * tiles_per_shard + i, 0)
    out = pl.pallas_call(
        _dice_kernel,
        out_shape=jax.ShapeDtypeStruct((num_shards, 8, 128), jnp.float32),
        grid_spec=pltpu.PrefetchScalarGridSpec(
            num_scalar_prefetch=0,
            grid=(num_shards, tiles_per_shard),
            in_specs=[
                pl.BlockSpec((row_tile, W), in_map),
                pl.BlockSpec((row_tile, W), in_map),
            ],
            out_specs=pl.BlockSpec((1, 8, 128), lambda c, i: (c, 0, 0)),
            scratch_shapes=[
                pltpu.VMEM((8, W), jnp.float32),   # numer vector accumulator
                pltpu.VMEM((8, W), jnp.float32),   # denom vector accumulator
            ],
        ),
        compiler_params=pltpu.CompilerParams(
            dimension_semantics=("parallel", "arbitrary"),
            vmem_limit_bytes=_VMEM_LIMIT_BYTES,
        ),
        cost_estimate=pl.CostEstimate(
            flops=6 * H * W,
            transcendentals=H * W,
            bytes_accessed=H * W * (logits2d.dtype.itemsize
                                    + label2d.dtype.itemsize)
            + num_shards * 8 * 128 * 4,
        ),
    )(logits2d, label2d)

    # Combine per-shard partials into the scalar Dice loss.
    numer = jnp.sum(out[:, 0, 0])
    denom = jnp.sum(out[:, 1, 0])
    return 1.0 - (2.0 * numer + smooth) / (denom + smooth)


def _dice_loss_ref(logits, label):
    probs = jax.nn.sigmoid(logits.astype(jnp.float32))
    one_hot = jnp.where((label == 1) & (label != IGNORE_LB), 1.0, 0.0)
    numer = jnp.sum(probs * one_hot)
    denom = jnp.sum(probs + one_hot)
    return 1.0 - (2.0 * numer + SMOOTH) / (denom + SMOOTH)


if __name__ == "__main__":
    key = jax.random.PRNGKey(0)
    k1, k2 = jax.random.split(key)
    H, W = 128, 128
    logits = jax.random.normal(k1, (1, H, W), dtype=jnp.float32)
    # Labels in {0, 1, 255}: mostly 0/1 with some ignore pixels; produced
    # directly as uint8 so the kernel streams 1 byte/pixel from HBM.
    label = jax.random.randint(k2, (1, H, W), 0, 3, dtype=jnp.int32)
    label = jnp.where(label == 2, IGNORE_LB, label).astype(jnp.uint8)

    loss = jax.block_until_ready(dice_loss(logits, label))
    ref = jax.block_until_ready(_dice_loss_ref(logits, label))
    assert jnp.allclose(loss, ref, rtol=1e-5, atol=1e-5), (loss, ref)
    print("KERNEL_OK")
</pallas_src>

<mosaic_0001>
module attributes {stable_mosaic.version = 11 : i64} {
  func.func @_dice_kernel(%arg0: i32, %arg1: i32, %arg2: memref<64x128xf32, #tpu.memory_space<vmem>>, %arg3: memref<64x128xi8, #tpu.memory_space<vmem>>, %arg4: memref<1x8x128xf32, #tpu.memory_space<vmem>>, %arg5: memref<8x128xf32, #tpu.memory_space<vmem>>, %arg6: memref<8x128xf32, #tpu.memory_space<vmem>>) attributes {dimension_semantics = [#tpu.dimension_semantics<parallel>, #tpu.dimension_semantics<arbitrary>], iteration_bounds = array<i64: 2, 1>, scalar_prefetch = 0 : i64, scratch_operands = 2 : i64, tpu.core_type = #tpu.core_type<tc>, window_params = [{transform_indices = @transform_0, window_bounds = array<i64: 64, 128>}, {transform_indices = @transform_1, window_bounds = array<i64: 64, 128>}, {transform_indices = @transform_2, window_bounds = array<i64: 1, 8, 128>}]} {
    %c0_i32 = arith.constant 0 : i32
    %0 = arith.cmpi eq, %arg1, %c0_i32 : i32
    %1 = arith.extui %0 : i1 to i32
    %c0_i32_0 = arith.constant 0 : i32
    %2 = arith.cmpi ne, %1, %c0_i32_0 : i32
    scf.if %2 {
      %cst_20 = arith.constant 0.000000e+00 : f32
      %32 = vector.broadcast %cst_20 : f32 to vector<8x128xf32>
      %c0_21 = arith.constant 0 : index
      %c0_22 = arith.constant 0 : index
      %33 = vector.load %arg5[%c0_21, %c0_22] : memref<8x128xf32, #tpu.memory_space<vmem>>, vector<8x128xf32>
      tpu.vector_store %arg5[%c0_21, %c0_22], %32 {strides = array<i32>} : memref<8x128xf32, #tpu.memory_space<vmem>>, vector<8x128xf32>,
      %cst_23 = arith.constant 0.000000e+00 : f32
      %34 = vector.broadcast %cst_23 : f32 to vector<8x128xf32>
      %c0_24 = arith.constant 0 : index
      %c0_25 = arith.constant 0 : index
      %35 = vector.load %arg6[%c0_24, %c0_25] : memref<8x128xf32, #tpu.memory_space<vmem>>, vector<8x128xf32>
      tpu.vector_store %arg6[%c0_24, %c0_25], %34 {strides = array<i32>} : memref<8x128xf32, #tpu.memory_space<vmem>>, vector<8x128xf32>,
    } else {
    }
    %c0 = arith.constant 0 : index
    %c0_1 = arith.constant 0 : index
    %3 = vector.load %arg2[%c0, %c0_1] : memref<64x128xf32, #tpu.memory_space<vmem>>, vector<64x128xf32>
    %4 = arith.negf %3 : vector<64x128xf32>
    %5 = math.exp %4 : vector<64x128xf32>
    %cst = arith.constant 1.000000e+00 : f32
    %6 = vector.broadcast %cst : f32 to vector<64x128xf32>
    %7 = arith.addf %6, %5 : vector<64x128xf32>
    %8 = arith.divf %6, %7 : vector<64x128xf32>
    %c0_2 = arith.constant 0 : index
    %c0_3 = arith.constant 0 : index
    %9 = vector.load %arg3[%c0_2, %c0_3] : memref<64x128xi8, #tpu.memory_space<vmem>>, vector<64x128xi8>
    %10 = arith.uitofp %9 : vector<64x128xi8> to vector<64x128xf32>
    %cst_4 = arith.constant 1.000000e+00 : f32
    %11 = vector.broadcast %cst_4 : f32 to vector<64x128xf32>
    %12 = arith.cmpf oeq, %10, %11 : vector<64x128xf32>
    %cst_5 = arith.constant 0.000000e+00 : f32
    %13 = vector.broadcast %cst_5 : f32 to vector<64x128xf32>
    %14 = arith.select %12, %8, %13 : vector<64x128xi1>, vector<64x128xf32>
    %cst_6 = arith.constant 1.000000e+00 : f32
    %cst_7 = arith.constant 0.000000e+00 : f32
    %15 = vector.broadcast %cst_6 : f32 to vector<64x128xf32>
    %16 = vector.broadcast %cst_7 : f32 to vector<64x128xf32>
    %17 = arith.select %12, %15, %16 : vector<64x128xi1>, vector<64x128xf32>
    %c0_8 = arith.constant 0 : index
    %c0_9 = arith.constant 0 : index
    %18 = vector.load %arg5[%c0_8, %c0_9] : memref<8x128xf32, #tpu.memory_space<vmem>>, vector<8x128xf32>
    %19 = vector.shape_cast %14 : vector<64x128xf32> to vector<8x8x128xf32>
    %cst_10 = arith.constant dense<0.000000e+00> : vector<8x128xf32>
    %20 = vector.multi_reduction <add>, %19, %cst_10 [0] : vector<8x8x128xf32> to vector<8x128xf32>
    %21 = arith.addf %18, %20 : vector<8x128xf32>
    %c0_11 = arith.constant 0 : index
    %c0_12 = arith.constant 0 : index
    %22 = vector.load %arg5[%c0_11, %c0_12] : memref<8x128xf32, #tpu.memory_space<vmem>>, vector<8x128xf32>
    tpu.vector_store %arg5[%c0_11, %c0_12], %21 {strides = array<i32>} : memref<8x128xf32, #tpu.memory_space<vmem>>, vector<8x128xf32>,
    %c0_13 = arith.constant 0 : index
    %c0_14 = arith.constant 0 : index
    %23 = vector.load %arg6[%c0_13, %c0_14] : memref<8x128xf32, #tpu.memory_space<vmem>>, vector<8x128xf32>
    %24 = arith.addf %8, %17 : vector<64x128xf32>
    %25 = vector.shape_cast %24 : vector<64x128xf32> to vector<8x8x128xf32>
    %cst_15 = arith.constant dense<0.000000e+00> : vector<8x128xf32>
    %26 = vector.multi_reduction <add>, %25, %cst_15 [0] : vector<8x8x128xf32> to vector<8x128xf32>
    %27 = arith.addf %23, %26 : vector<8x128xf32>
    %c0_16 = arith.constant 0 : index
    %c0_17 = arith.constant 0 : index
    %28 = vector.load %arg6[%c0_16, %c0_17] : memref<8x128xf32, #tpu.memory_space<vmem>>, vector<8x128xf32>
    tpu.vector_store %arg6[%c0_16, %c0_17], %27 {strides = array<i32>} : memref<8x128xf32, #tpu.memory_space<vmem>>, vector<8x128xf32>,
    %c0_i32_18 = arith.constant 0 : i32
    %29 = arith.cmpi eq, %arg1, %c0_i32_18 : i32
    %30 = arith.extui %29 : i1 to i32
    %c0_i32_19 = arith.constant 0 : i32
    %31 = arith.cmpi ne, %30, %c0_i32_19 : i32
    scf.if %31 {
      %c0_20 = arith.constant 0 : index
      %c0_21 = arith.constant 0 : index
      %32 = vector.load %arg5[%c0_20, %c0_21] : memref<8x128xf32, #tpu.memory_space<vmem>>, vector<8x128xf32>
      %33 = vector.shape_cast %32 : vector<8x128xf32> to vector<1x8x128xf32>
      %cst_22 = arith.constant dense<0.000000e+00> : vector<1xf32>
      %34 = vector.multi_reduction <add>, %33, %cst_22 [1, 2] : vector<1x8x128xf32> to vector<1xf32>
      %35 = vector.shape_cast %34 : vector<1xf32> to vector<1x1x1xf32>
      %36 = vector.extract %35[0, 0, 0] : f32 from vector<1x1x1xf32>
      %c0_23 = arith.constant 0 : index
      %c0_24 = arith.constant 0 : index
      %37 = vector.load %arg6[%c0_23, %c0_24] : memref<8x128xf32, #tpu.memory_space<vmem>>, vector<8x128xf32>
      %38 = vector.shape_cast %37 : vector<8x128xf32> to vector<1x8x128xf32>
      %cst_25 = arith.constant dense<0.000000e+00> : vector<1xf32>
      %39 = vector.multi_reduction <add>, %38, %cst_25 [1, 2] : vector<1x8x128xf32> to vector<1xf32>
      %40 = vector.shape_cast %39 : vector<1xf32> to vector<1x1x1xf32>
      %41 = vector.extract %40[0, 0, 0] : f32 from vector<1x1x1xf32>
      %42 = tpu.iota {dimensions = array<i32: 1>} : vector<1x8x128xi32>
      %c0_i32_26 = arith.constant 0 : i32
      %43 = vector.broadcast %c0_i32_26 : i32 to vector<1x8x128xi32>
      %44 = arith.cmpi eq, %42, %43 : vector<1x8x128xi32>
      %c1_i32 = arith.constant 1 : i32
      %45 = vector.broadcast %c1_i32 : i32 to vector<1x8x128xi32>
      %46 = arith.cmpi eq, %42, %45 : vector<1x8x128xi32>
      %cst_27 = arith.constant 0.000000e+00 : f32
      %47 = vector.broadcast %41 : f32 to vector<1x8x128xf32>
      %48 = vector.broadcast %cst_27 : f32 to vector<1x8x128xf32>
      %49 = arith.select %46, %47, %48 : vector<1x8x128xi1>, vector<1x8x128xf32>
      %50 = vector.broadcast %36 : f32 to vector<1x8x128xf32>
      %51 = arith.select %44, %50, %49 : vector<1x8x128xi1>, vector<1x8x128xf32>
      %c0_28 = arith.constant 0 : index
      %c0_29 = arith.constant 0 : index
      %c0_30 = arith.constant 0 : index
      %52 = vector.load %arg4[%c0_28, %c0_29, %c0_30] : memref<1x8x128xf32, #tpu.memory_space<vmem>>, vector<1x8x128xf32>
      tpu.vector_store %arg4[%c0_28, %c0_29, %c0_30], %51 {strides = array<i32>} : memref<1x8x128xf32, #tpu.memory_space<vmem>>, vector<1x8x128xf32>,
    } else {
    }
    return
  }
  func.func @transform_0(%arg0: i32, %arg1: i32) -> (i32, i32) {
    %c1_i32 = arith.constant 1 : i32
    %0 = arith.muli %arg0, %c1_i32 : i32
    %1 = arith.addi %0, %arg1 : i32
    %c0_i32 = arith.constant 0 : i32
    %c0_i32_0 = arith.constant 0 : i32
    return %1, %c0_i32 : i32, i32
  }
  func.func @transform_1(%arg0: i32, %arg1: i32) -> (i32, i32) {
    %c1_i32 = arith.constant 1 : i32
    %0 = arith.muli %arg0, %c1_i32 : i32
    %1 = arith.addi %0, %arg1 : i32
    %c0_i32 = arith.constant 0 : i32
    %c0_i32_0 = arith.constant 0 : i32
    return %1, %c0_i32 : i32, i32
  }
  func.func @transform_2(%arg0: i32, %arg1: i32) -> (i32, i32, i32) {
    %c0_i32 = arith.constant 0 : i32
    %c0_i32_0 = arith.constant 0 : i32
    %c0_i32_1 = arith.constant 0 : i32
    return %arg0, %c0_i32, %c0_i32_0 : i32, i32, i32
  }
}

</mosaic_0001>

<bundles_post_ra>
// kernel: tpu_custom_call.1
= control target key start
LH: loop header
LB: loop body
LE: loop exit
PB: predicated region body
PF: predicated region fallthrough
CT: control target
= control target key end

     0   :  { %7 = vsyncpa [#allocation5], 0  ;;  %s1106_s0 = inlined_call_operand.hbm [shape: f32[128,128], index: 0, kind: input, shape index: {}]   ;;  %s1107_s1 = inlined_call_operand.hbm [shape: u8[128,128], index: 1, kind: input, shape index: {}]   ;;  %s1108_s2 = inlined_call_operand.hbm [shape: f32[2,8,128], index: 2, kind: output, shape index: {}]  }
   0x1   :  { %9 = vsyncpa [#allocation5 + $0x1], 0 }
   0x2   :  { %10 = vsyncpa [#allocation8], 0 }
   0x3   :  { %12 = vsyncpa [#allocation8 + $0x1], 0 }
   0x4   :  { %13 = vsyncpa [#allocation6], 0 }
   0x5   :  { %15 = vsyncpa [#allocation6 + $0x1], 0  ;;  %s816_s9 = smov 0   ;;  %s818_s10 = smov 0  }
   0x6   :  { %s820_s11 = smov 0   ;;  %s822_s12 = smov 0  }
   0x7   :  { %s824_s13 = smov 0   ;;  %s826_s14 = smov 0  }
   0x8 LB: > { %s513_s15 = sadd.s32 4294967295, %s793_s14   ;;  %s514_s16 = sadd.s32 4294967294, %s793_s14   ;;  %s793_s14 = sphi %s826_s14, %s21_s14   ;;  %s789_s13 = sphi %s824_s13, %s1140_s13   ;;  %s785_s12 = sphi %s822_s12, %s1139_s12   ;;  %s781_s11 = sphi %s820_s11, %s1138_s11   ;;  %s777_s10 = sphi %s818_s10, %s1137_s10   ;;  %s773_s9 = sphi %s816_s9, %s1136_s9  }
   0x9   : > { %s33_s17 = sadd.s32 1, %s789_s13  ;;  %s42_s18 = sadd.s32 1, %s781_s11 }
   0xa   : > { %p35_p0 = scmp.ge.s32.totalorder %s33_s17, 2  ;;  %p49_p1 = scmp.ne.s32.totalorder %s781_s11, %s777_s10 }
   0xb   : > { %p50_p2 = scmp.eq.s32.totalorder %s793_s14, 0  ;;  %p55_p3 = scmp.ne.s32.totalorder %s777_s10, %s773_s9 }
   0xc   : > { %s1142_s17 = smov (%p35_p0, %s33_s17), 0  ;;  %p56_p5 = scmp.eq.s32.totalorder %s513_s15, 0 }
   0xd   : > { %p857_p4 = por %p50_p2, %p49_p1  ;;  %s39_s20 = ssub.s32 %s789_s13, %s1142_s17 }
   0xe   : > { %p107_p6 = scmp.eq.s32.totalorder %s513_s15, 1  ;;  %p40_p7 = scmp.eq.s32.totalorder %s39_s20, 0 }
   0xf   : > { %p863_p8 = por %p56_p5, %p55_p3  ;;  %p113_p10 = scmp.eq.s32.totalorder %s514_s16, 1 }
  0x10   : > { %p867_p9 = por %p107_p6, %p49_p1  ;;  %p562_p13 = scmp.lt.s32.totalorder %s793_s14, 2 }
  0x11   : > { %s1112_s21 = scalar_select %p863_p8, 1, 0 }
  0x12   : > { %s1113_s22 = scalar_select %p867_p9, 1, 0 }
  0x13   : > { %s872_s23 = scalar_select %p40_p7, %s781_s11, %s42_s18  }
  0x14   : > { %p874_p11 = por %p113_p10, %p55_p3  ;;  %s881_s25 = sand.u32 1, %s781_s11  }
  0x15   : > { %s517_s26 = sshll.u32 %s881_s25, 6  ;;  %s539_s27 = sshll.u32 %s789_s13, 10 }
  0x16   : > { %s1114_s24 = scalar_select %p874_p11, 1, 0 }
  0x17   : > { %s888_s30 = scalar_lea.hbm %s1106_s0, %s539_s27  ;;  %s137_s3 = scalar_lea.vmem [#allocation4], %s517_s26 }
  0x18   : > { %s145_s4 = sshll.u32 %s137_s3, 4  ;;  %p894_p0 = pnand %p562_p13, %p857_p4  ;;  %s890_s4 = int_to_ptr.vmem [resolvable:$true] %s145_s4 }
  0x19   : > { %s134_s6 = scalar_lea.sflag [#allocation5], %s881_s25  ;;  %s647_s7 = scalar_lea.hbm %s888_s30, 1024 }
  0x1a   : > { %p648_p2 = scmp.ne.s32.totalorder %s888_s30, %s647_s7  ;;  %p649_p3 = pneg %p894_p0 }
  0x1b   : > { %s652_s16 = scalar_lea.hbm %s1106_s0, 2048  ;;  %p653_p4 = scmp.lt.u32.totalorder %s888_s30, %s1106_s0 }
  0x1c   : > { %p650_p5 = pnand %p649_p3, %p648_p2  ;;  %p654_p7 = scmp.lt.u32.totalorder %s652_s16, %s647_s7 }
  0x1d   : > { %p656_p13 = scmp.lt.u32.totalorder %s647_s7, %s888_s30 }
  0x1e   : > { %p651_p6 = pneg %p650_p5  ;;  %p655_p10 = por %p654_p7, %p653_p4 }
  0x20   : > { %p657_p12 = por %p656_p13, %p655_p10 }
  0x22   : > { %p658_p1 = pnand %p657_p12, %p651_p6 }
  0x24   : > { %661 = shalt.err (!%p658_p1)
}
  0x25   : > { %s662_s20 = scalar_lea.vmem %s890_s4, 1024  ;;  %s795_s26 = smov [#allocation4]  }
  0x26   : > { %p663_p2 = scmp.ne.s32.totalorder %s890_s4, %s662_s20  ;;  %s667_s27 = sshll.u32 %s795_s26, 4  ;;  %s668_s27 = int_to_ptr.vmem [resolvable:$false] %s667_s27 }
  0x27   : > { %s669_s28 = scalar_lea.vmem %s668_s27, 2048  ;;  %p670_p9 = scmp.lt.s32.totalorder %s890_s4, %s668_s27 }
  0x28   : > { %p665_p5 = pnand %p663_p2, %p649_p3  ;;  %p671_p4 = scmp.lt.s32.totalorder %s669_s28, %s662_s20 }
  0x2a   : > { %p666_p11 = pneg %p665_p5  ;;  %p672_p7 = por %p671_p4, %p670_p9 }
  0x2c   : > { %p673_p10 = pnand %p672_p7, %p666_p11 }
  0x2e   : > { %676 = shalt.err (!%p673_p10)
}
  0x2f   : > { %s796_s29 = smov 128   ;;  %s797_s3 = smov 8  }
  0x30   : > { %554 = dma.hbm_to_vmem [thread:$0]  (!%p894_p0), %s888_s30, 1024, %s890_s4, %s134_s6, %s796_s29, %s796_s29, %s797_s3  }
  0x31   : > { %p175_p9 = scmp.lt.s32.totalorder %s793_s14, 3  ;;  %s520_s7 = sshll.u32 %s881_s25, 4 }
  0x32   : > { %s540_s8 = sshll.u32 %s789_s13, 8  ;;  %p1116_p11 = scmp.ge.s32.totalorder %s793_s14, 1 }
  0x33   : > { %s942_s19 = scalar_lea.hbm %s1107_s1, %s540_s8  ;;  %s159_s20 = scalar_lea.vmem [#allocation7], %s520_s7 }
  0x34   : > { %p935_p12 = pnand %p1116_p11, %p175_p9  ;;  %s167_s26 = sshll.u32 %s159_s20, 4  ;;  %s944_s26 = int_to_ptr.vmem [resolvable:$true] %s167_s26 }
  0x35   : > { %s156_s30 = scalar_lea.sflag [#allocation8], %s881_s25  ;;  %s677_s4 = scalar_lea.hbm %s942_s19, 256 }
  0x36   : > { %p678_p1 = scmp.ne.s32.totalorder %s942_s19, %s677_s4  ;;  %s682_s28 = scalar_lea.hbm %s1107_s1, 512 }
  0x37   : > { %p683_p2 = scmp.lt.u32.totalorder %s942_s19, %s1107_s1  ;;  %p684_p5 = scmp.lt.u32.totalorder %s682_s28, %s677_s4 }
  0x38   : > { %p680_p6 = pnand %p678_p1, %p649_p3  ;;  %p686_p7 = scmp.lt.u32.totalorder %s677_s4, %s942_s19 }
  0x39   : > { %p685_p4 = por %p684_p5, %p683_p2 }
  0x3a   : > { %p681_p13 = pneg %p680_p6 }
  0x3b   : > { %p687_p10 = por %p686_p7, %p685_p4 }
  0x3d   : > { %p688_p9 = pnand %p687_p10, %p681_p13 }
  0x3f   : > { %691 = shalt.err (!%p688_p9)
}
  0x40   : > { %s692_s7 = scalar_lea.vmem %s944_s26, 256  ;;  %s798_s18 = smov [#allocation7]  }
  0x41   : > { %p693_p11 = scmp.ne.s32.totalorder %s944_s26, %s692_s7  ;;  %s697_s20 = sshll.u32 %s798_s18, 4  ;;  %s698_s20 = int_to_ptr.vmem [resolvable:$false] %s697_s20 }
  0x42   : > { %s699_s6 = scalar_lea.vmem %s698_s20, 512  ;;  %p700_p8 = scmp.lt.s32.totalorder %s944_s26, %s698_s20 }
  0x43   : > { %p695_p1 = pnand %p693_p11, %p649_p3  ;;  %p701_p2 = scmp.lt.s32.totalorder %s699_s6, %s692_s7 }
  0x45   : > { %p696_p6 = pneg %p695_p1  ;;  %p702_p5 = por %p701_p2, %p700_p8 }
  0x47   : > { %p703_p4 = pnand %p702_p5, %p696_p6 }
  0x49   : > { %706 = shalt.err (!%p703_p4)
}
  0x4a   : > { %557 = dma.hbm_to_vmem [thread:$0]  (!%p894_p0), %s942_s19, 256, %s944_s26, %s156_s30, %s796_s29, %s796_s29, %s797_s3  }
  0x4b   : > { %179 = sbr.rel (%p935_p12) target bundleno = 354 (0x162), region = 28  ;;  %s978_s4 = sand.u32 (!%p935_p12), 1, %s777_s10  }
  0x4c   : > { %s524_s27 = sshll.u32 (!%p935_p12), %s978_s4, 6  ;;  %s182_s28 = scalar_lea.sflag (!%p935_p12), [#allocation5], %s978_s4 }
  0x4d   : > { %s185_s5 = scalar_lea.vmem (!%p935_p12), [#allocation4], %s524_s27  ;;  %p1118_p8 = scmp.ne.s32.totalorder (!%p935_p12), %s1112_s21, 0 }
  0x52   : > { %760 = dma.done.wait (%p1118_p8), %s182_s28, 1024  }
  0x53   : > { %762 = vsyncadd (%p1118_p8), %s182_s28, 4294966272  ;;  %s525_s25 = sshll.u32 %s978_s4, 4  ;;  %s191_s29 = scalar_lea.sflag [#allocation8], %s978_s4 }
  0x54   : > { %s988_s3 = scalar_lea.vmem [#allocation7], %s525_s25 }
  0x55   : > { %764 = dma.done.wait (%p1118_p8), %s191_s29, 256  }
  0x56   : > { %766 = vsyncadd (%p1118_p8), %s191_s29, 4294967040  ;;  %v230_v0 = vld [vmem:[%s185_s5] sm:$0xff]  ;;  %v231_v1 = vld [vmem:[%s185_s5 + $0x8] sm:$0xff]  ;;  %v799_v56 = vmov 0.0   ;;  %v387_v62 = vlaneseq  ;;  %s526_s21 = sshll.u32 %s978_s4, 3  ;;  %s536_s15 = sshll.u32 %s785_s12, 7 }
  0x57   : > { %v232_v2 = vld [vmem:[%s185_s5 + $0x10] sm:$0xff]  ;;  %v233_v3 = vld [vmem:[%s185_s5 + $0x18] sm:$0xff]  ;;  %v234_v4 = vld [vmem:[%s185_s5 + $0x20] sm:$0xff]  ;;  %v527_v6 = vmul.f32 -1.442695, %v230_v0  ;;  %s219_s26 = scalar_lea.vmem [#allocation9], %s526_s21  ;;  %s1057_s18 = scalar_lea.hbm %s1108_s2, %s536_s15 }
  0x58   : > { %v235_v5 = vld [vmem:[%s185_s5 + $0x28] sm:$0xff]  ;;  %v236_v7 = vld [vmem:[%s185_s5 + $0x30] sm:$0xff]  ;;  %v528_v8 = vmul.f32 -1.442695, %v231_v1  ;;  %v529_v9 = vmul.f32 -1.442695, %v232_v2 }
  0x59   : > { %v237_v10 = vld [vmem:[%s185_s5 + $0x38] sm:$0xff]  ;;  %615 = vpow2.f32 %v527_v6  ;;  %v530_v11 = vmul.f32 -1.442695, %v233_v3  ;;  %v531_v12 = vmul.f32 -1.442695, %v234_v4  ;;  %v286_v16 = vld [vmem:[%s988_s3] sm:$0xff] }
  0x5a   : > { %617 = vpow2.f32 %v528_v8  ;;  %v532_v13 = vmul.f32 -1.442695, %v235_v5  ;;  %v533_v14 = vmul.f32 -1.442695, %v236_v7  ;;  %v534_v15 = vmul.f32 -1.442695, %v237_v10 }
  0x5b   : > { %619 = vpow2.f32 %v529_v9  ;;  %v288_v17 = vunpack.c.0.s8 %v286_v16  ;;  %v289_v18 = vunpack.c.1.s8 %v286_v16  ;;  %v287_v20 = vld [vmem:[%s988_s3 + $0x8] sm:$0xff]  ;;  %v290_v21 = vunpack.c.2.s8 %v286_v16  ;;  %s410_s30 = sshll.u32 %s219_s26, 4  ;;  %s397_s12 = scalar_lea.sflag [#allocation6], %s978_s4  ;;  %s1059_s30 = int_to_ptr.vmem [resolvable:$true] %s410_s30 }
  0x5c   : > { %621 = vpow2.f32 %v530_v11  ;;  %v291_v24 = vunpack.c.3.s8 %v286_v16  ;;  %v292_v30 = vunpack.c.0.s8 %v287_v20  ;;  %v293_v37 = vunpack.c.1.s8 %v287_v20  ;;  %s707_s20 = scalar_lea.vmem %s1059_s30, 128  ;;  %p1133_p3 = scmp.ne.s32.totalorder %s1113_s22, 0 }
  0x5d   : > { %623 = vpow2.f32 %v531_v12  ;;  %v296_v27 = vand.u32 255, %v288_v17  ;;  %v297_v31 = vand.u32 255, %v289_v18  ;;  %v298_v34 = vand.u32 255, %v290_v21  ;;  %p708_p0 = scmp.ne.s32.totalorder %s1059_s30, %s707_s20  ;;  %s800_s6 = smov [#allocation9]  }
  0x5e   : > { %625 = vpow2.f32 %v532_v13  ;;  %v299_v38 = vand.u32 255, %v291_v24  ;;  %v294_v41 = vunpack.c.2.s8 %v287_v20  ;;  %v300_v45 = vand.u32 255, %v292_v30  ;;  %s711_s27 = sshll.u32 %s800_s6, 4  ;;  %s712_s27 = int_to_ptr.vmem [resolvable:$false] %s711_s27 }
  0x5f   : > { %627 = vpow2.f32 %v533_v14  ;;  %v304_v42 = vcvt.s32.f32 %v296_v27  ;;  %v305_v46 = vcvt.s32.f32 %v297_v31  ;;  %v306_v48 = vcvt.s32.f32 %v298_v34  ;;  %p709_p12 = pnand %p708_p0, %p1133_p3  ;;  %s713_s28 = scalar_lea.vmem %s712_s27, 256 }
  0x60   : > { %629 = vpow2.f32 %v534_v15  ;;  %v301_v49 = vand.u32 255, %v293_v37  ;;  %v307_v50 = vcvt.s32.f32 %v299_v38  ;;  %v295_v51 = vunpack.c.3.s8 %v287_v20  ;;  %p714_p7 = scmp.lt.s32.totalorder %s1059_s30, %s712_s27  ;;  %p715_p10 = scmp.lt.s32.totalorder %s713_s28, %s707_s20 }
  0x61   : > { %vm996_vm0 = vcmp.eq.f32.partialorder %v304_v42, 1.0  ;;  %v302_v53 = vand.u32 255, %v294_v41  ;;  %v308_v54 = vcvt.s32.f32 %v300_v45  ;;  %vm1000_vm1 = vcmp.eq.f32.partialorder %v305_v46, 1.0  ;;  %p710_p13 = pneg %p709_p12 }
  0x62   : > { %v328_v57 = vsel %vm996_vm0, 1.0, %v799_v56  ;;  %vm1006_vm2 = vcmp.eq.f32.partialorder %v306_v48, 1.0  ;;  %v329_v59 = vsel %vm1000_vm1, 1.0, %v799_v56  ;;  %v309_v61 = vcvt.s32.f32 %v301_v49  ;;  %p716_p9 = por %p715_p10, %p714_p7 }
  0x63   : > { %v616_v19 = vpop.eup %615  ;;  %vm1012_vm3 = vcmp.eq.f32.partialorder %v307_v50, 1.0  ;;  %v330_v63 = vsel %vm1006_vm2, 1.0, %v799_v56  ;;  %v303_v1 = vand.u32 255, %v295_v51  ;;  %v310_v6 = vcvt.s32.f32 %v302_v53 }
  0x64   : > { %v618_v22 = vpop.eup %617  ;;  %v262_v23 = vadd.f32 1.0, %v616_v19  ;;  %v331_v3 = vsel %vm1012_vm3, 1.0, %v799_v56  ;;  %vm1022_vm4 = vcmp.eq.f32.partialorder %v308_v54, 1.0  ;;  %vm1032_vm5 = vcmp.eq.f32.partialorder %v309_v61, 1.0  ;;  %p717_p11 = pnand %p716_p9, %p710_p13 }
  0x65   : > { %v620_v25 = vpop.eup %619  ;;  %v263_v26 = vadd.f32 1.0, %v618_v22  ;;  %v332_v12 = vsel %vm1022_vm4, 1.0, %v799_v56  ;;  %v311_v21 = vcvt.s32.f32 %v303_v1  ;;  %v333_v22 = vsel %vm1032_vm5, 1.0, %v799_v56 }
  0x66   : > { %v622_v28 = vpop.eup %621  ;;  %v264_v29 = vadd.f32 1.0, %v620_v25  ;;  %631 = vrcp.f32 %v262_v23  ;;  %vm1040_vm6 = vcmp.eq.f32.partialorder %v310_v6, 1.0 }
  0x67   : > { %v624_v32 = vpop.eup %623  ;;  %v265_v33 = vadd.f32 1.0, %v622_v28  ;;  %633 = vrcp.f32 %v263_v26  ;;  %vm319_vm7 = vcmp.eq.f32.partialorder %v311_v21, 1.0 }
  0x68   : > { %v626_v35 = vpop.eup %625  ;;  %v266_v36 = vadd.f32 1.0, %v624_v32  ;;  %635 = vrcp.f32 %v264_v29  ;;  %v334_v29 = vsel %vm1040_vm6, 1.0, %v799_v56  ;;  %v335_v37 = vsel %vm319_vm7, 1.0, %v799_v56 }
  0x69   : > { %v628_v39 = vpop.eup %627  ;;  %v267_v40 = vadd.f32 1.0, %v626_v35  ;;  %637 = vrcp.f32 %v265_v33 }
  0x6a   : > { %v630_v43 = vpop.eup %629  ;;  %v268_v44 = vadd.f32 1.0, %v628_v39  ;;  %639 = vrcp.f32 %v266_v36 }
  0x6b   : > { %v269_v47 = vadd.f32 1.0, %v630_v43  ;;  %641 = vrcp.f32 %v267_v40 }
  0x6c   : > { %643 = vrcp.f32 %v268_v44 }
  0x6d   : > { %645 = vrcp.f32 %v269_v47 }
  0x70   : > { %v632_v60 = vpop.eup %631 }
  0x71   : > { %v634_v0 = vpop.eup %633  ;;  %v320_v2 = vsel %vm996_vm0, %v632_v60, 0.0  ;;  %v347_v4 = vadd.f32 %v632_v60, %v328_v57 }
  0x72   : > { %v636_v5 = vpop.eup %635  ;;  %v321_v8 = vsel %vm1000_vm1, %v634_v0, 0.0  ;;  %v348_v9 = vadd.f32 %v634_v0, %v329_v59 }
  0x73   : > { %v638_v10 = vpop.eup %637  ;;  %v322_v11 = vsel %vm1006_vm2, %v636_v5, 0.0  ;;  %v337_v13 = vadd.f32 %v321_v8, %v320_v2  ;;  %v349_v14 = vadd.f32 %v636_v5, %v330_v63  ;;  %v388_v63 = vshrl.u32 %v387_v62, 7 }
  0x74   : > { %v640_v15 = vpop.eup %639  ;;  %v323_v17 = vsel %vm1012_vm3, %v638_v10, 0.0  ;;  %v350_v18 = vadd.f32 %v638_v10, %v331_v3  ;;  %v355_v19 = vadd.f32 %v348_v9, %v347_v4 }
  0x75   : > { %v642_v20 = vpop.eup %641  ;;  %v338_v23 = vadd.f32 %v337_v13, %v322_v11  ;;  %v324_v25 = vsel %vm1022_vm4, %v640_v15, 0.0  ;;  %v351_v26 = vadd.f32 %v640_v15, %v332_v12  ;;  %vm390_vm8 = vcmp.eq.s32.totalorder %v388_v63, 1 }
  0x76   : > { %v356_v27 = vadd.f32 %v355_v19, %v349_v14  ;;  %v644_v28 = vpop.eup %643  ;;  %v325_v31 = vsel %vm1032_vm5, %v642_v20, 0.0  ;;  %v352_v32 = vadd.f32 %v642_v20, %v333_v22  ;;  %vm389_vm9 = vcmp.eq.s32.totalorder %v388_v63, 0 }
  0x77   : > { %v339_v30 = vadd.f32 %v338_v23, %v323_v17  ;;  %v646_v34 = vpop.eup %645  ;;  %v326_v36 = vsel %vm1040_vm6, %v644_v28, 0.0  ;;  %v353_v38 = vadd.f32 %v644_v28, %v334_v29 }
  0x78   : > { %v357_v33 = vadd.f32 %v356_v27, %v350_v18  ;;  %v327_v41 = vsel %vm319_vm7, %v646_v34, 0.0  ;;  %v354_v44 = vadd.f32 %v646_v34, %v335_v37 }
  0x79   : > { %v340_v35 = vadd.f32 %v339_v30, %v324_v25 }
  0x7a   : > { %v358_v39 = vadd.f32 %v357_v33, %v351_v26 }
  0x7b   : > { %v341_v40 = vadd.f32 %v340_v35, %v325_v31 }
  0x7c   : > { %v359_v42 = vadd.f32 %v358_v39, %v352_v32 }
  0x7d   : > { %v342_v43 = vadd.f32 %v341_v40, %v326_v36 }
  0x7e   : > { %v360_v45 = vadd.f32 %v359_v42, %v353_v38 }
  0x7f   : > { %v343_v46 = vadd.f32 %v342_v43, %v327_v41 }
  0x80   : > { %v361_v47 = vadd.f32 %v360_v45, %v354_v44 }
  0x81   : > { %368 = vadd.xlane.f32.xlu0 %v343_v46 }
  0x85   : > { %378 = vadd.xlane.f32.xlu0 %v361_v47 }
 0x10e   : > { %v369_v48 = vpop.xlane.xlu0 %368 }
 0x10f   : > { %v370_v49 = vrot.slane %v369_v48, 4 }
 0x111   : > { %v371_v50 = vadd.f32 %v370_v49, %v369_v48 }
 0x112   : > { %v379_v51 = vpop.xlane.xlu0 %378 }
 0x113   : > { %v372_v52 = vrot.slane %v371_v50, 2  ;;  %v380_v53 = vrot.slane %v379_v51, 4 }
 0x115   : > { %v381_v54 = vadd.f32 %v380_v53, %v379_v51  ;;  %v373_v55 = vadd.f32 %v372_v52, %v371_v50 }
 0x117   : > { %v382_v56 = vrot.slane %v381_v54, 2  ;;  %v374_v57 = vrot.slane %v373_v55, 1 }
 0x119   : > { %v383_v58 = vadd.f32 %v382_v56, %v381_v54  ;;  %v375_v59 = vadd.f32 %v374_v57, %v373_v55 }
 0x11b   : > { %541 = vpush %v375_v59  ;;  %v384_v60 = vrot.slane %v383_v58, 1 }
 0x11d   : > { %v385_v61 = vadd.f32 %v384_v60, %v383_v58 }
 0x11f   : > { %543 = vpush %v385_v61 }
 0x14c   : > { %s542_s19 = spop %541 }
 0x14d   : > { %v393_v1 = vstv %s542_s19 }
 0x150   : > { %s544_s8 = spop %543 }
 0x151   : > { %v391_v0 = vstv %s544_s8 }
 0x152   : > { %v392_v2 = vsel %vm390_vm8, %v391_v0, 0.0 }
 0x153   : > { %v394_v3 = vsel %vm389_vm9, %v393_v1, %v392_v2 }
 0x154   : > { %395 = vst [vmem:[%s219_s26] sm:$0xff] %v394_v3 }
 0x155   : > { %720 = shalt.err (!%p717_p11)
}
 0x156   : > { %s721_s4 = scalar_lea.hbm %s1057_s18, 128  ;;  %s725_s29 = scalar_lea.hbm %s1108_s2, 256 }
 0x157   : > { %p722_p1 = scmp.ne.s32.totalorder %s1057_s18, %s721_s4  ;;  %p726_p5 = scmp.lt.u32.totalorder %s1057_s18, %s1108_s2 }
 0x158   : > { %p727_p4 = scmp.lt.u32.totalorder %s725_s29, %s721_s4  ;;  %p729_p0 = scmp.lt.u32.totalorder %s721_s4, %s1057_s18 }
 0x159   : > { %p723_p6 = pnand %p722_p1, %p1133_p3 }
 0x15a   : > { %p728_p8 = por %p727_p4, %p726_p5 }
 0x15b   : > { %p724_p2 = pneg %p723_p6 }
 0x15c   : > { %p730_p12 = por %p729_p0, %p728_p8 }
 0x15e   : > { %p731_p13 = pnand %p730_p12, %p724_p2 }
 0x160   : > { %734 = shalt.err (!%p731_p13)
}
 0x161   : > { %549 = dma.vmem_to_hbm [thread:$0]  (%p1133_p3), %s1059_s30, 128, %s1057_s18, %s397_s12  }
 0x162 PF: > { %s422_s15 = sand.u32 1, %s773_s9   ;;  %p1134_p7 = scmp.ne.s32.totalorder %s1114_s24, 0 }
 0x163   : > { %p1135_p10 = scmp.ge.s32.totalorder %s793_s14, 2  ;;  %s423_s19 = scalar_lea.sflag [#allocation6], %s422_s15 }
 0x165   : > { %p559_p9 = pnand %p1135_p10, %p1134_p7 }
 0x167   : > { %768 = dma.done.wait (!%p559_p9), %s423_s19, 128  }
 0x168   : > { %770 = vsyncadd (!%p559_p9), %s423_s19, 4294967168  ;;  %s21_s14 = sadd.s32 1, %s793_s14   ;;  %s1136_s9 = smov %s777_s10 }
 0x169   : > { %p18_p11 = scmp.ge.s32.totalorder %s21_s14, 4   ;;  %s1137_s10 = smov %s781_s11 }
 0x16a   : > { %s1138_s11 = smov %s872_s23  ;;  %s1139_s12 = smov %s789_s13 }
 0x16b   : > { %s1140_s13 = smov %s1142_s17  ;;  %20 = sbr.rel (!%p18_p11) target bundleno = 8 (0x8), region = 94 }
 0x172   :  { %428 = vsyncpa [#allocation5], 1 }
 0x173   :  { %430 = vsyncpa [#allocation5 + $0x1], 1 }
 0x174   :  { %431 = vsyncpa [#allocation8], 1 }
 0x175   :  { %433 = vsyncpa [#allocation8 + $0x1], 1 }
 0x176   :  { %434 = vsyncpa [#allocation6], 1 }
 0x177   :  { %436 = vsyncpa [#allocation6 + $0x1], 1 }

</bundles_post_ra>
